<compile_context>
chip_gen: v7x
topology: tpu7x:2x2x1
jax: 0.10.0
libtpu: 0.0.40
codegen_flags: <defaults>
</compile_context>

<pallas_src>
import jax
import jax.numpy as jnp
from jax import lax
from jax.experimental import pallas as pl
from jax.experimental.pallas import tpu as pltpu

LANE = 128


def encoder_gru_kernel(x_ref,    # (L, Hp)     embedded input rows (resident)
                       h0_ref,   # (1, Hp)     initial hidden (resident)
                       wx_ref,   # (Hp, 3*Hp)  packed W_ih^T [r|z|n] (resident)
                       wh_ref,   # (Hp, 3*Hp)  packed W_hh^T [r|z|n] (resident)
                       bx_ref,   # (1, 3*Hp)   packed b_ih (resident, f32)
                       bh_ref,   # (1, 3*Hp)   packed b_hh (resident, f32)
                       out_ref,  # (L, Hp)     per-step hidden outputs (resident)
                       gx_scr):  # (L, 3*Hp)   f32 scratch: input-side pre-activations
    Hp = h0_ref.shape[-1]
    L = x_ref.shape[0]

    # Hoisted input projection: one MXU matmul with M = L (real M dimension),
    # done once, outside the serial recurrence.
    gx_scr[...] = (
        jnp.dot(x_ref[...], wx_ref[...], preferred_element_type=jnp.float32)
        + bx_ref[...]
    )

    def step(t, h):
        gx = gx_scr[pl.ds(t, 1), :]                               # (1, 3*Hp)
        gh = (
            jnp.dot(h.astype(wh_ref.dtype), wh_ref[...],
                    preferred_element_type=jnp.float32)
            + bh_ref[...]
        )                                                          # (1, 3*Hp)
        r = jax.nn.sigmoid(gx[:, 0 * Hp:1 * Hp] + gh[:, 0 * Hp:1 * Hp])
        z = jax.nn.sigmoid(gx[:, 1 * Hp:2 * Hp] + gh[:, 1 * Hp:2 * Hp])
        n = jnp.tanh(gx[:, 2 * Hp:3 * Hp] + r * gh[:, 2 * Hp:3 * Hp])
        h_new = (1.0 - z) * n + z * h
        out_ref[pl.ds(t, 1), :] = h_new                            # resident store
        return h_new

    # Serial recurrence, fully inside the kernel (no per-token grid steps).
    lax.fori_loop(0, L, step, h0_ref[...], unroll=True)


def init_params(key, input_size, hidden_size):
    """Deterministic parameters matching nn.Embedding + nn.GRU shapes."""
    k_emb, k_wih, k_whh, k_bih, k_bhh = jax.random.split(key, 5)
    bound = 1.0 / jnp.sqrt(hidden_size)
    return {
        # nn.Embedding(input_size, hidden_size): N(0, 1)
        "embedding": jax.random.normal(k_emb, (input_size, hidden_size), jnp.float32),
        # nn.GRU(hidden_size, hidden_size): weight_ih_l0 (3H, H), weight_hh_l0 (3H, H)
        "weight_ih": jax.random.uniform(k_wih, (3 * hidden_size, hidden_size),
                                        jnp.float32, -bound, bound),
        "weight_hh": jax.random.uniform(k_whh, (3 * hidden_size, hidden_size),
                                        jnp.float32, -bound, bound),
        "bias_ih": jax.random.uniform(k_bih, (3 * hidden_size,),
                                      jnp.float32, -bound, bound),
        "bias_hh": jax.random.uniform(k_bhh, (3 * hidden_size,),
                                      jnp.float32, -bound, bound),
    }


def pack_encoder_params(params, lane=LANE, weight_dtype=jnp.float32):
    """One-time packing: pad H to 128 lanes, pre-transpose and pack gate weights.

    Wx / Wh are (Hp, 3*Hp) with column groups [r | z | n]; padded rows/cols and
    padded bias lanes are zero so padded hidden lanes stay exactly zero.
    Set weight_dtype=jnp.bfloat16 on v6e/v7x for large H (halves VMEM, native
    MXU dtype); biases and the hidden carry remain f32.
    """
    emb = params["embedding"].astype(jnp.float32)          # (V, H)
    Wih = params["weight_ih"].astype(jnp.float32)          # (3H, H)
    Whh = params["weight_hh"].astype(jnp.float32)          # (3H, H)
    bih = params["bias_ih"].astype(jnp.float32)            # (3H,)
    bhh = params["bias_hh"].astype(jnp.float32)            # (3H,)

    V, H = emb.shape
    Hp = ((H + lane - 1) // lane) * lane

    emb_p = jnp.pad(emb, ((0, 0), (0, Hp - H)))            # (V, Hp)

    def pack_w(W):
        out = jnp.zeros((Hp, 3 * Hp), jnp.float32)
        for g in range(3):
            out = out.at[0:H, g * Hp:g * Hp + H].set(W[g * H:(g + 1) * H].T)
        return out

    def pack_b(b):
        out = jnp.zeros((1, 3 * Hp), jnp.float32)
        for g in range(3):
            out = out.at[0, g * Hp:g * Hp + H].set(b[g * H:(g + 1) * H])
        return out

    return {
        "emb": emb_p.astype(weight_dtype),
        "wx": pack_w(Wih).astype(weight_dtype),
        "wh": pack_w(Whh).astype(weight_dtype),
        "bx": pack_b(bih),                                  # biases stay f32
        "bh": pack_b(bhh),
        "H": H, "Hp": Hp, "V": V,
    }


def _resident(shape):
    """Full-array block with a constant index map (stays resident in VMEM)."""
    nd = len(shape)
    return pl.BlockSpec(shape, lambda i, _nd=nd: (0,) * _nd)


def encoder_rnn_sequence(tokens, hidden, packed):
    """Run the whole L-step GRU recurrence inside ONE pallas_call.

    tokens: (L,) int32, hidden: (1, 1, H).
    Returns (outputs (L, 1, H), new_hidden (1, 1, H)).
    """
    H, Hp = packed["H"], packed["Hp"]
    L = int(tokens.shape[0])

    tok = tokens.astype(jnp.int32).reshape(L)
    # Gather all embedding rows once (single XLA gather), feed as resident block.
    x = jnp.take(packed["emb"], tok, axis=0)                # (L, Hp)
    h0 = jnp.zeros((1, Hp), jnp.float32).at[:, :H].set(
        hidden.reshape(1, H).astype(jnp.float32))

    outs = pl.pallas_call(
        encoder_gru_kernel,
        out_shape=jax.ShapeDtypeStruct((L, Hp), jnp.float32),
        grid=(1,),
        in_specs=[
            _resident((L, Hp)),            # embedded inputs
            _resident((1, Hp)),            # initial hidden
            _resident((Hp, 3 * Hp)),       # packed W_ih^T
            _resident((Hp, 3 * Hp)),       # packed W_hh^T
            _resident((1, 3 * Hp)),        # packed b_ih
            _resident((1, 3 * Hp)),        # packed b_hh
        ],
        out_specs=_resident((L, Hp)),      # resident output: one HBM writeback
        scratch_shapes=[pltpu.VMEM((L, 3 * Hp), jnp.float32)],  # gx pre-activations
        compiler_params=pltpu.CompilerParams(
            dimension_semantics=("arbitrary",),
        ),
    )(x, h0, packed["wx"], packed["wh"], packed["bx"], packed["bh"])

    outputs = outs[:, :H].reshape(L, 1, H)                  # strip lane padding
    new_hidden = outputs[-1].reshape(1, 1, H)
    return outputs, new_hidden


def encoder_rnn_forward(token, hidden, packed):
    """Mirrors EncoderRNN.forward for one token: returns (output, hidden), both (1,1,H)."""
    tokens = token.astype(jnp.int32).reshape(1)
    outputs, new_hidden = encoder_rnn_sequence(tokens, hidden, packed)
    return outputs.reshape(1, 1, packed["H"]), new_hidden


def gru_reference(tokens, hidden, params):
    """Pure-JAX reference (PyTorch GRU semantics) for correctness checking."""
    emb = params["embedding"]
    Wih, Whh = params["weight_ih"], params["weight_hh"]
    bih, bhh = params["bias_ih"], params["bias_hh"]
    H = hidden.shape[-1]
    h = hidden.reshape(1, H).astype(jnp.float32)
    hp = jax.lax.Precision.HIGHEST
    outs = []
    for t in range(tokens.shape[0]):
        x = emb[tokens[t]].reshape(1, H)
        gi = jnp.dot(x, Wih.T, precision=hp) + bih
        gh = jnp.dot(h, Whh.T, precision=hp) + bhh
        r = jax.nn.sigmoid(gi[:, 0:H] + gh[:, 0:H])
        z = jax.nn.sigmoid(gi[:, H:2 * H] + gh[:, H:2 * H])
        n = jnp.tanh(gi[:, 2 * H:3 * H] + r * gh[:, 2 * H:3 * H])
        h = (1.0 - z) * n + z * h
        outs.append(h)
    return jnp.stack(outs).reshape(-1, 1, H), h.reshape(1, 1, H)


if __name__ == "__main__":
    INPUT_SIZE = 16   # vocab size
    HIDDEN = 32
    SEQ = 8

    key = jax.random.PRNGKey(0)
    params = init_params(key, INPUT_SIZE, HIDDEN)
    packed = pack_encoder_params(params)          # one-time weight packing (f32)

    # --- Module-faithful single-step forward (EncoderRNN.forward) ---
    token = jnp.array([3], dtype=jnp.int32)
    hidden = jnp.zeros((1, 1, HIDDEN), jnp.float32)       # EncoderRNN.initHidden()
    output, new_hidden = encoder_rnn_forward(token, hidden, packed)
    jax.block_until_ready((output, new_hidden))
    assert output.shape == (1, 1, HIDDEN)
    assert new_hidden.shape == (1, 1, HIDDEN)

    ref_out, ref_hid = gru_reference(token, hidden, params)
    assert jnp.allclose(output, ref_out, atol=2e-3, rtol=2e-3)
    assert jnp.allclose(new_hidden, ref_hid, atol=2e-3, rtol=2e-3)

    # --- Multi-token sequence: whole recurrence in one pallas_call ---
    tokens = jax.random.randint(jax.random.PRNGKey(1), (SEQ,), 0, INPUT_SIZE, jnp.int32)
    seq_outs, seq_hid = encoder_rnn_sequence(tokens, hidden, packed)
    jax.block_until_ready((seq_outs, seq_hid))
    ref_outs, ref_h = gru_reference(tokens, hidden, params)
    assert jnp.allclose(seq_outs, ref_outs, atol=2e-3, rtol=2e-3)
    assert jnp.allclose(seq_hid, ref_h, atol=2e-3, rtol=2e-3)

    # TODO(synk): batch dimension (B > 1) kept at 1 to mirror the module's (1,1,H)
    # contract; with batching, make batch a leading 'parallel' grid axis (v7x 2 TCs)
    # and stack batch rows into M of the per-step h-matmul.
    print("KERNEL_OK")
</pallas_src>

<mosaic_0001>
module attributes {stable_mosaic.version = 11 : i64} {
  func.func @encoder_gru_kernel(%arg0: i32, %arg1: memref<1x128xf32, #tpu.memory_space<vmem>>, %arg2: memref<1x128xf32, #tpu.memory_space<vmem>>, %arg3: memref<128x384xf32, #tpu.memory_space<vmem>>, %arg4: memref<128x384xf32, #tpu.memory_space<vmem>>, %arg5: memref<1x384xf32, #tpu.memory_space<vmem>>, %arg6: memref<1x384xf32, #tpu.memory_space<vmem>>, %arg7: memref<1x128xf32, #tpu.memory_space<vmem>>, %arg8: memref<1x384xf32, #tpu.memory_space<vmem>>) attributes {dimension_semantics = [#tpu.dimension_semantics<arbitrary>], iteration_bounds = array<i64: 1>, scalar_prefetch = 0 : i64, scratch_operands = 1 : i64, tpu.core_type = #tpu.core_type<tc>, window_params = [{pipeline_mode = #tpu.pipeline_mode<synchronous>, transform_indices = @transform_0, window_bounds = array<i64: 1, 128>}, {pipeline_mode = #tpu.pipeline_mode<synchronous>, transform_indices = @transform_1, window_bounds = array<i64: 1, 128>}, {pipeline_mode = #tpu.pipeline_mode<synchronous>, transform_indices = @transform_2, window_bounds = array<i64: 128, 384>}, {pipeline_mode = #tpu.pipeline_mode<synchronous>, transform_indices = @transform_3, window_bounds = array<i64: 128, 384>}, {pipeline_mode = #tpu.pipeline_mode<synchronous>, transform_indices = @transform_4, window_bounds = array<i64: 1, 384>}, {pipeline_mode = #tpu.pipeline_mode<synchronous>, transform_indices = @transform_5, window_bounds = array<i64: 1, 384>}, {pipeline_mode = #tpu.pipeline_mode<synchronous>, transform_indices = @transform_6, window_bounds = array<i64: 1, 128>}]} {
    %c0 = arith.constant 0 : index
    %c0_0 = arith.constant 0 : index
    %0 = vector.load %arg1[%c0, %c0_0] : memref<1x128xf32, #tpu.memory_space<vmem>>, vector<1x128xf32>
    %c0_1 = arith.constant 0 : index
    %c0_2 = arith.constant 0 : index
    %1 = vector.load %arg3[%c0_1, %c0_2] : memref<128x384xf32, #tpu.memory_space<vmem>>, vector<128x384xf32>
    %cst = arith.constant dense<0.000000e+00> : vector<1x384xf32>
    %2 = tpu.matmul %0, %1, %cst {dimension_numbers = #tpu.dot_dimension_numbers<[1], [0], [0], [1], [0, 0, 1, 1], [], []>} : vector<1x128xf32>, vector<128x384xf32>, vector<1x384xf32> -> vector<1x384xf32>
    %c0_3 = arith.constant 0 : index
    %c0_4 = arith.constant 0 : index
    %3 = vector.load %arg5[%c0_3, %c0_4] : memref<1x384xf32, #tpu.memory_space<vmem>>, vector<1x384xf32>
    %4 = arith.addf %2, %3 : vector<1x384xf32>
    %c0_5 = arith.constant 0 : index
    %c0_6 = arith.constant 0 : index
    %5 = vector.load %arg8[%c0_5, %c0_6] : memref<1x384xf32, #tpu.memory_space<vmem>>, vector<1x384xf32>
    tpu.vector_store %arg8[%c0_5, %c0_6], %4 {strides = array<i32>} : memref<1x384xf32, #tpu.memory_space<vmem>>, vector<1x384xf32>,
    %c0_7 = arith.constant 0 : index
    %c0_8 = arith.constant 0 : index
    %6 = vector.load %arg2[%c0_7, %c0_8] : memref<1x128xf32, #tpu.memory_space<vmem>>, vector<1x128xf32>
    %c0_i32 = arith.constant 0 : i32
    %7 = arith.index_cast %c0_i32 : i32 to index
    %c0_9 = arith.constant 0 : index
    %8 = vector.load %arg8[%7, %c0_9] : memref<1x384xf32, #tpu.memory_space<vmem>>, vector<1x384xf32>
    %c0_10 = arith.constant 0 : index
    %c0_11 = arith.constant 0 : index
    %9 = vector.load %arg4[%c0_10, %c0_11] : memref<128x384xf32, #tpu.memory_space<vmem>>, vector<128x384xf32>
    %cst_12 = arith.constant dense<0.000000e+00> : vector<1x384xf32>
    %10 = tpu.matmul %6, %9, %cst_12 {dimension_numbers = #tpu.dot_dimension_numbers<[1], [0], [0], [1], [0, 0, 1, 1], [], []>} : vector<1x128xf32>, vector<128x384xf32>, vector<1x384xf32> -> vector<1x384xf32>
    %c0_13 = arith.constant 0 : index
    %c0_14 = arith.constant 0 : index
    %11 = vector.load %arg6[%c0_13, %c0_14] : memref<1x384xf32, #tpu.memory_space<vmem>>, vector<1x384xf32>
    %12 = arith.addf %10, %11 : vector<1x384xf32>
    %13 = vector.extract_strided_slice %8 {offsets = [0, 0], sizes = [1, 128], strides = [1, 1]} : vector<1x384xf32> to vector<1x128xf32>
    %14 = vector.extract_strided_slice %12 {offsets = [0, 0], sizes = [1, 128], strides = [1, 1]} : vector<1x384xf32> to vector<1x128xf32>
    %15 = arith.addf %13, %14 : vector<1x128xf32>
    %16 = arith.negf %15 : vector<1x128xf32>
    %17 = math.exp %16 : vector<1x128xf32>
    %cst_15 = arith.constant 1.000000e+00 : f32
    %18 = vector.broadcast %cst_15 : f32 to vector<1x128xf32>
    %19 = arith.addf %18, %17 : vector<1x128xf32>
    %20 = arith.divf %18, %19 : vector<1x128xf32>
    %21 = vector.extract_strided_slice %8 {offsets = [0, 128], sizes = [1, 128], strides = [1, 1]} : vector<1x384xf32> to vector<1x128xf32>
    %22 = vector.extract_strided_slice %12 {offsets = [0, 128], sizes = [1, 128], strides = [1, 1]} : vector<1x384xf32> to vector<1x128xf32>
    %23 = arith.addf %21, %22 : vector<1x128xf32>
    %24 = arith.negf %23 : vector<1x128xf32>
    %25 = math.exp %24 : vector<1x128xf32>
    %cst_16 = arith.constant 1.000000e+00 : f32
    %26 = vector.broadcast %cst_16 : f32 to vector<1x128xf32>
    %27 = arith.addf %26, %25 : vector<1x128xf32>
    %28 = arith.divf %26, %27 : vector<1x128xf32>
    %29 = vector.extract_strided_slice %8 {offsets = [0, 256], sizes = [1, 128], strides = [1, 1]} : vector<1x384xf32> to vector<1x128xf32>
    %30 = vector.extract_strided_slice %12 {offsets = [0, 256], sizes = [1, 128], strides = [1, 1]} : vector<1x384xf32> to vector<1x128xf32>
    %31 = arith.mulf %20, %30 : vector<1x128xf32>
    %32 = arith.addf %29, %31 : vector<1x128xf32>
    %33 = math.tanh %32 : vector<1x128xf32>
    %cst_17 = arith.constant 1.000000e+00 : f32
    %34 = vector.broadcast %cst_17 : f32 to vector<1x128xf32>
    %35 = arith.subf %34, %28 : vector<1x128xf32>
    %36 = arith.mulf %35, %33 : vector<1x128xf32>
    %37 = arith.mulf %28, %6 : vector<1x128xf32>
    %38 = arith.addf %36, %37 : vector<1x128xf32>
    %39 = arith.index_cast %c0_i32 : i32 to index
    %c0_18 = arith.constant 0 : index
    %40 = vector.load %arg7[%39, %c0_18] : memref<1x128xf32, #tpu.memory_space<vmem>>, vector<1x128xf32>
    tpu.vector_store %arg7[%39, %c0_18], %38 {strides = array<i32>} : memref<1x128xf32, #tpu.memory_space<vmem>>, vector<1x128xf32>,
    %c1_i32 = arith.constant 1 : i32
    return
  }
  func.func @transform_0(%arg0: i32) -> (i32, i32) {
    %c0_i32 = arith.constant 0 : i32
    %c0_i32_0 = arith.constant 0 : i32
    %c0_i32_1 = arith.constant 0 : i32
    return %c0_i32, %c0_i32_0 : i32, i32
  }
  func.func @transform_1(%arg0: i32) -> (i32, i32) {
    %c0_i32 = arith.constant 0 : i32
    %c0_i32_0 = arith.constant 0 : i32
    %c0_i32_1 = arith.constant 0 : i32
    return %c0_i32, %c0_i32_0 : i32, i32
  }
  func.func @transform_2(%arg0: i32) -> (i32, i32) {
    %c0_i32 = arith.constant 0 : i32
    %c0_i32_0 = arith.constant 0 : i32
    %c0_i32_1 = arith.constant 0 : i32
    return %c0_i32, %c0_i32_0 : i32, i32
  }
  func.func @transform_3(%arg0: i32) -> (i32, i32) {
    %c0_i32 = arith.constant 0 : i32
    %c0_i32_0 = arith.constant 0 : i32
    %c0_i32_1 = arith.constant 0 : i32
    return %c0_i32, %c0_i32_0 : i32, i32
  }
  func.func @transform_4(%arg0: i32) -> (i32, i32) {
    %c0_i32 = arith.constant 0 : i32
    %c0_i32_0 = arith.constant 0 : i32
    %c0_i32_1 = arith.constant 0 : i32
    return %c0_i32, %c0_i32_0 : i32, i32
  }
  func.func @transform_5(%arg0: i32) -> (i32, i32) {
    %c0_i32 = arith.constant 0 : i32
    %c0_i32_0 = arith.constant 0 : i32
    %c0_i32_1 = arith.constant 0 : i32
    return %c0_i32, %c0_i32_0 : i32, i32
  }
  func.func @transform_6(%arg0: i32) -> (i32, i32) {
    %c0_i32 = arith.constant 0 : i32
    %c0_i32_0 = arith.constant 0 : i32
    %c0_i32_1 = arith.constant 0 : i32
    return %c0_i32, %c0_i32_0 : i32, i32
  }
}

</mosaic_0001>

<bundles_post_ra>
// kernel: tpu_custom_call.1
= control target key start
LH: loop header
LB: loop body
LE: loop exit
PB: predicated region body
PF: predicated region fallthrough
CT: control target
= control target key end

     0   :  { %11 = vsyncpa [#allocation4], 0  ;;  %s1020_s0 = inlined_call_operand.hbm [shape: f32[1,128], index: 0, kind: input, shape index: {}]   ;;  %s1021_s1 = inlined_call_operand.vmem [shape: f32[1,128], index: 1, kind: input, shape index: {}]   ;;  %s1022_s2 = inlined_call_operand.hbm [shape: f32[128,384], index: 2, kind: input, shape index: {}]   ;;  %s1023_s3 = inlined_call_operand.hbm [shape: f32[128,384], index: 3, kind: input, shape index: {}]   ;;  %s1024_s4 = inlined_call_operand.vmem [shape: f32[1,384], index: 4, kind: input, shape index: {}]   ;;  %s1025_s5 = inlined_call_operand.vmem [shape: f32[1,384], index: 5, kind: input, shape index: {}]   ;;  %s1026_s6 = inlined_call_operand.hbm [shape: f32[1,128], index: 6, kind: output, shape index: {}]  }
   0x1   :  { %12 = vsyncpa [#allocation7], 0 }
   0x2   :  { %13 = vsyncpa [#allocation5], 0  ;;  %s885_s21 = smov [#allocation6]   ;;  %s791_s25 = scalar_lea.hbm %s1022_s2, 6144 }
   0x3   :  { %s31_s22 = sshll.u32 %s885_s21, 4  ;;  %p792_p0 = scmp.ne.s32.totalorder %s1022_s2, %s791_s25  ;;  %s32_s22 = int_to_ptr.vmem [resolvable:$true] %s31_s22 }
   0x4   :  { %p795_p1 = scmp.lt.u32.totalorder %s791_s25, %s1022_s2 }
   0x6   :  { %p797_p2 = pnand %p795_p1, %p792_p0 }
   0x8   :  { %800 = shalt.err (!%p797_p2)
}
   0x9   :  { %s801_s30 = scalar_lea.vmem %s32_s22, 6144  ;;  %p806_p4 = scmp.lt.s32.totalorder %s32_s22, %s32_s22 }
   0xa   :  { %p802_p3 = scmp.ne.s32.totalorder %s32_s22, %s801_s30  ;;  %p807_p5 = scmp.lt.s32.totalorder %s801_s30, %s801_s30 }
   0xc   :  { %p808_p6 = por %p807_p5, %p806_p4 }
   0xe   :  { %p809_p7 = pnand %p808_p6, %p802_p3 }
  0x10   :  { %812 = shalt.err (!%p809_p7)
}
  0x11   :  { %s886_s7 = smov 384   ;;  %s887_s8 = smov 24  }
  0x12   :  { %37 = dma.hbm_to_vmem [thread:$0]  %s1022_s2, 6144, %s32_s22, [#allocation7], %s886_s7, %s886_s7, %s887_s8  }
  0x13   :  { %s888_s11 = smov [#allocation3]   ;;  %s889_s13 = smov [#allocation8]  }
  0x14   :  { %s20_s12 = sshll.u32 %s888_s11, 4  ;;  %s43_s14 = sshll.u32 %s889_s13, 4  ;;  %s21_s12 = int_to_ptr.vmem [resolvable:$true] %s20_s12  ;;  %s44_s14 = int_to_ptr.vmem [resolvable:$true] %s43_s14 }
  0x15   :  { %s813_s17 = scalar_lea.hbm %s1020_s0, 16 }
  0x16   :  { %p814_p8 = scmp.ne.s32.totalorder %s1020_s0, %s813_s17  ;;  %p817_p9 = scmp.lt.u32.totalorder %s813_s17, %s1020_s0 }
  0x18   :  { %p819_p10 = pnand %p817_p9, %p814_p8 }
  0x1a   :  { %822 = shalt.err (!%p819_p10)
}
  0x1b   :  { %s823_s2 = scalar_lea.vmem %s21_s12, 16  ;;  %s827_s22 = scalar_lea.vmem %s21_s12, 32 }
  0x1c   :  { %p824_p11 = scmp.ne.s32.totalorder %s21_s12, %s823_s2  ;;  %p828_p12 = scmp.lt.s32.totalorder %s21_s12, %s21_s12 }
  0x1d   :  { %p829_p13 = scmp.lt.s32.totalorder %s827_s22, %s823_s2 }
  0x1f   :  { %p830_p0 = por %p829_p13, %p828_p12 }
  0x21   :  { %p831_p1 = pnand %p830_p0, %p824_p11 }
  0x23   :  { %834 = shalt.err (!%p831_p1)
}
  0x24   :  { %23 = dma.hbm_to_vmem [thread:$0]  %s1020_s0, 16, %s21_s12, [#allocation4]  }
  0x25   :  { %s835_s27 = scalar_lea.hbm %s1023_s3, 6144 }
  0x26   :  { %p836_p2 = scmp.ne.s32.totalorder %s1023_s3, %s835_s27  ;;  %p839_p3 = scmp.lt.u32.totalorder %s835_s27, %s1023_s3 }
  0x28   :  { %p841_p4 = pnand %p839_p3, %p836_p2 }
  0x2a   :  { %844 = shalt.err (!%p841_p4)
}
  0x2b   :  { %s845_s10 = scalar_lea.vmem %s44_s14, 6144  ;;  %p850_p6 = scmp.lt.s32.totalorder %s44_s14, %s44_s14 }
  0x2c   :  { %p846_p5 = scmp.ne.s32.totalorder %s44_s14, %s845_s10  ;;  %p851_p7 = scmp.lt.s32.totalorder %s845_s10, %s845_s10 }
  0x2e   :  { %p852_p8 = por %p851_p7, %p850_p6 }
  0x30   :  { %p853_p9 = pnand %p852_p8, %p846_p5 }
  0x32   :  { %856 = shalt.err (!%p853_p9)
}
  0x33   :  { %49 = dma.hbm_to_vmem [thread:$0]  %s1023_s3, 6144, %s44_s14, [#allocation7], %s886_s7, %s886_s7, %s887_s8  }
  0x34   :  { %879 = dma.done.wait [#allocation4], 16  }
  0x35   :  { %880 = vsyncadd [#allocation4], 4294967280 }
  0x36   :  { %881 = dma.done.wait [#allocation7], 12288  }
  0x37   :  { %882 = vsyncadd [#allocation7], 4294955008  ;;  %v890_v0 = vmov 0.0|0.0   ;;  %v891_v1 = vmov 0.0   ;;  %vm892_vm0 = vmmov 0   ;;  %v65_v2 = vld [vmem:[#allocation6 + $0x8] sm:$0xff] }
  0x38   :  { %691 = vmatprep.subr.bf16.mxu1 %v890_v0  ;;  %193 = vmatprep.mubr.f32.mxu0 %v891_v1  ;;  %v68_v3 = vld [vmem:[#allocation6 + $0x20] sm:$0xff]  ;;  %v67_v6 = vld [vmem:[#allocation6 + $0x18] sm:$0xff]  ;;  %v74_v8 = vld [vmem:[#allocation6 + $0x50] sm:$0xff] }
  0x39   :  { %621 = vmatprep.mubr.msk.f32.mxu1 %vm892_vm0, %v891_v1  ;;  %v64_v4 = vld [vmem:[#allocation6] sm:$0xff]  ;;  %v659_v5 = vpack.c.bf16 %v68_v3, %v65_v2  ;;  %v71_v7 = vld [vmem:[#allocation6 + $0x38] sm:$0xff]  ;;  %v66_v11 = vld [vmem:[#allocation6 + $0x10] sm:$0xff] }
  0x3a   :  { %v661_v9 = vpack.c.bf16 %v67_v6, %v64_v4  ;;  %v663_v10 = vpack.c.bf16 %v74_v8, %v71_v7  ;;  %v69_v12 = vld [vmem:[#allocation6 + $0x28] sm:$0xff]  ;;  %v70_v13 = vld [vmem:[#allocation6 + $0x30] sm:$0xff]  ;;  %v80_v17 = vld [vmem:[#allocation6 + $0x80] sm:$0xff] }
  0x3b   :  { %660 = vmatprep.subr.bf16.mxu0 %v659_v5  ;;  %v692_v14 = vpack.c.bf16 %v69_v12, %v66_v11  ;;  %v73_v15 = vld [vmem:[#allocation6 + $0x48] sm:$0xff]  ;;  %v72_v19 = vld [vmem:[#allocation6 + $0x40] sm:$0xff]  ;;  %v75_v20 = vld [vmem:[#allocation6 + $0x58] sm:$0xff] }
  0x3c   :  { %v77_v16 = vld [vmem:[#allocation6 + $0x68] sm:$0xff]  ;;  %662 = vmatpush1.bf16.msra.mxu0 %v661_v9  ;;  %v665_v18 = vpack.c.bf16 %v73_v15, %v70_v13  ;;  %v695_v22 = vpack.c.bf16 %v75_v20, %v72_v19  ;;  %v76_v23 = vld [vmem:[#allocation6 + $0x60] sm:$0xff]  ;;  %v79_v24 = vld [vmem:[#allocation6 + $0x78] sm:$0xff] }
  0x3d   :  { %664 = vmatprep.subr.bf16.mxu0 %v663_v10  ;;  %693 = vmatpush3.bf16.msra.mxu1 %v692_v14  ;;  %v667_v21 = vpack.c.bf16 %v80_v17, %v77_v16  ;;  %v83_v25 = vld [vmem:[#allocation6 + $0x98] sm:$0xff]  ;;  %v86_v26 = vld [vmem:[#allocation6 + $0xb0] sm:$0xff]  ;;  %v81_v28 = vld [vmem:[#allocation6 + $0x88] sm:$0xff]  ;;  %v669_v29 = vpack.c.bf16 %v79_v24, %v76_v23 }
  0x3e   :  { %694 = vmatprep.subr.bf16.mxu1 %v890_v0  ;;  %v78_v27 = vld [vmem:[#allocation6 + $0x70] sm:$0xff]  ;;  %v671_v30 = vpack.c.bf16 %v86_v26, %v83_v25  ;;  %v85_v33 = vld [vmem:[#allocation6 + $0xa8] sm:$0xff]  ;;  %v92_v35 = vld [vmem:[#allocation6 + $0xe0] sm:$0xff] }
  0x3f   :  { %v698_v31 = vpack.c.bf16 %v81_v28, %v78_v27  ;;  %v82_v32 = vld [vmem:[#allocation6 + $0x90] sm:$0xff]  ;;  %v89_v34 = vld [vmem:[#allocation6 + $0xc8] sm:$0xff]  ;;  %v84_v36 = vld [vmem:[#allocation6 + $0xa0] sm:$0xff] }
  0x40   :  { %666 = vmatpush1.bf16.msra.mxu0 %v665_v18  ;;  %v87_v37 = vld [vmem:[#allocation6 + $0xb8] sm:$0xff]  ;;  %v673_v38 = vpack.c.bf16 %v85_v33, %v82_v32  ;;  %v675_v39 = vpack.c.bf16 %v92_v35, %v89_v34  ;;  %v88_v41 = vld [vmem:[#allocation6 + $0xc0] sm:$0xff]  ;;  %v98_v44 = vld [vmem:[#allocation6 + $0x110] sm:$0xff] }
  0x41   :  { %668 = vmatprep.subr.bf16.mxu0 %v667_v21  ;;  %696 = vmatpush3.bf16.msra.mxu1 %v695_v22  ;;  %v701_v40 = vpack.c.bf16 %v87_v37, %v84_v36  ;;  %v91_v42 = vld [vmem:[#allocation6 + $0xd8] sm:$0xff]  ;;  %v90_v45 = vld [vmem:[#allocation6 + $0xd0] sm:$0xff]  ;;  %v93_v46 = vld [vmem:[#allocation6 + $0xe8] sm:$0xff] }
  0x42   :  { %697 = vmatprep.subr.bf16.mxu1 %v890_v0  ;;  %v95_v43 = vld [vmem:[#allocation6 + $0xf8] sm:$0xff]  ;;  %v677_v47 = vpack.c.bf16 %v91_v42, %v88_v41  ;;  %v704_v49 = vpack.c.bf16 %v93_v46, %v90_v45  ;;  %v94_v50 = vld [vmem:[#allocation6 + $0xf0] sm:$0xff]  ;;  %v97_v51 = vld [vmem:[#allocation6 + $0x108] sm:$0xff] }
  0x43   :  { %v679_v48 = vpack.c.bf16 %v98_v44, %v95_v43  ;;  %v101_v52 = vld [vmem:[#allocation6 + $0x128] sm:$0xff]  ;;  %v104_v53 = vld [vmem:[#allocation6 + $0x140] sm:$0xff]  ;;  %v99_v55 = vld [vmem:[#allocation6 + $0x118] sm:$0xff]  ;;  %v681_v56 = vpack.c.bf16 %v97_v51, %v94_v50 }
  0x44   :  { %670 = vmatpush1.bf16.msra.mxu0 %v669_v29  ;;  %v96_v54 = vld [vmem:[#allocation6 + $0x100] sm:$0xff]  ;;  %v683_v57 = vpack.c.bf16 %v104_v53, %v101_v52  ;;  %v103_v60 = vld [vmem:[#allocation6 + $0x138] sm:$0xff]  ;;  %v110_v62 = vld [vmem:[#allocation6 + $0x170] sm:$0xff] }
  0x45   :  { %672 = vmatprep.subr.bf16.mxu0 %v671_v30  ;;  %699 = vmatpush3.bf16.msra.mxu1 %v698_v31  ;;  %v707_v58 = vpack.c.bf16 %v99_v55, %v96_v54  ;;  %v100_v59 = vld [vmem:[#allocation6 + $0x120] sm:$0xff]  ;;  %v107_v61 = vld [vmem:[#allocation6 + $0x158] sm:$0xff]  ;;  %v102_v63 = vld [vmem:[#allocation6 + $0x130] sm:$0xff] }
  0x46   :  { %700 = vmatprep.subr.bf16.mxu1 %v890_v0  ;;  %v105_v2 = vld [vmem:[#allocation6 + $0x148] sm:$0xff]  ;;  %v685_v3 = vpack.c.bf16 %v103_v60, %v100_v59  ;;  %v687_v4 = vpack.c.bf16 %v110_v62, %v107_v61  ;;  %v106_v6 = vld [vmem:[#allocation6 + $0x150] sm:$0xff]  ;;  %v108_v8 = vld [vmem:[#allocation6 + $0x160] sm:$0xff] }
  0x47   :  { %v710_v5 = vpack.c.bf16 %v105_v2, %v102_v63  ;;  %v109_v7 = vld [vmem:[#allocation6 + $0x168] sm:$0xff]  ;;  %v111_v9 = vld [vmem:[#allocation6 + $0x178] sm:$0xff]  ;;  %v308_v11 = vld [vmem:[#allocation8 + $0x20] sm:$0xff] }
  0x48   :  { %674 = vmatpush1.bf16.msra.mxu0 %v673_v38  ;;  %v305_v10 = vld [vmem:[#allocation8 + $0x8] sm:$0xff]  ;;  %v689_v12 = vpack.c.bf16 %v109_v7, %v106_v6  ;;  %v713_v13 = vpack.c.bf16 %v111_v9, %v108_v8  ;;  %v304_v15 = vld [vmem:[#allocation8] sm:$0xff]  ;;  %v307_v16 = vld [vmem:[#allocation8 + $0x18] sm:$0xff] }
  0x49   :  { %676 = vmatprep.subr.bf16.mxu0 %v675_v39  ;;  %702 = vmatpush3.bf16.msra.mxu1 %v701_v40  ;;  %v715_v14 = vpack.c.bf16 %v308_v11, %v305_v10  ;;  %v311_v17 = vld [vmem:[#allocation8 + $0x38] sm:$0xff]  ;;  %v314_v18 = vld [vmem:[#allocation8 + $0x50] sm:$0xff]  ;;  %v309_v20 = vld [vmem:[#allocation8 + $0x28] sm:$0xff]  ;;  %v717_v22 = vpack.c.bf16 %v307_v16, %v304_v15 }
  0x4a   :  { %703 = vmatprep.subr.bf16.mxu1 %v890_v0  ;;  %v306_v19 = vld [vmem:[#allocation8 + $0x10] sm:$0xff]  ;;  %v63_v21 = vld [vmem:[#allocation3] sm:$0x1]  ;;  %v719_v23 = vpack.c.bf16 %v314_v18, %v311_v17  ;;  %v313_v25 = vld [vmem:[#allocation8 + $0x48] sm:$0xff] }
  0x4b   :  { %v310_v24 = vld [vmem:[#allocation8 + $0x30] sm:$0xff]  ;;  %v317_v26 = vld [vmem:[#allocation8 + $0x68] sm:$0xff]  ;;  %v748_v27 = vpack.c.bf16 %v309_v20, %v306_v19  ;;  %v320_v28 = vld [vmem:[#allocation8 + $0x80] sm:$0xff] }
  0x4c   :  { %678 = vmatpush1.bf16.msra.mxu0 %v677_v47  ;;  %v312_v29 = vld [vmem:[#allocation8 + $0x40] sm:$0xff]  ;;  %v315_v30 = vld [vmem:[#allocation8 + $0x58] sm:$0xff]  ;;  %v721_v31 = vpack.c.bf16 %v313_v25, %v310_v24  ;;  %v723_v32 = vpack.c.bf16 %v320_v28, %v317_v26  ;;  %v326_v37 = vld [vmem:[#allocation8 + $0xb0] sm:$0xff]  ;;  %v893_v25 = vmov 1966171168  }
  0x4d   :  { %680 = vmatprep.subr.bf16.mxu0 %v679_v48  ;;  %705 = vmatpush3.bf16.msra.mxu1 %v704_v49  ;;  %v316_v33 = vld [vmem:[#allocation8 + $0x60] sm:$0xff]  ;;  %v319_v34 = vld [vmem:[#allocation8 + $0x78] sm:$0xff]  ;;  %v751_v36 = vpack.c.bf16 %v315_v30, %v312_v29  ;;  %v318_v38 = vld [vmem:[#allocation8 + $0x70] sm:$0xff]  ;;  %v275_v26 = vunpack.c.l.s4 %v893_v25 }
  0x4e   :  { %706 = vmatprep.subr.bf16.mxu1 %v890_v0  ;;  %v323_v35 = vld [vmem:[#allocation8 + $0x98] sm:$0xff]  ;;  %v321_v39 = vld [vmem:[#allocation8 + $0x88] sm:$0xff]  ;;  %v725_v40 = vpack.c.bf16 %v319_v34, %v316_v33  ;;  %v322_v42 = vld [vmem:[#allocation8 + $0x90] sm:$0xff] }
  0x4f   :  { %v727_v41 = vpack.c.bf16 %v326_v37, %v323_v35  ;;  %v325_v43 = vld [vmem:[#allocation8 + $0xa8] sm:$0xff]  ;;  %v754_v45 = vpack.c.bf16 %v321_v39, %v318_v38  ;;  %v332_v46 = vld [vmem:[#allocation8 + $0xe0] sm:$0xff]  ;;  %v327_v48 = vld [vmem:[#allocation8 + $0xb8] sm:$0xff]  ;;  %v276_v30 = vunpack.c.0.s8 %v275_v26 }
  0x50   :  { %682 = vmatpush1.bf16.msra.mxu0 %v681_v56  ;;  %v329_v44 = vld [vmem:[#allocation8 + $0xc8] sm:$0xff]  ;;  %v324_v47 = vld [vmem:[#allocation8 + $0xa0] sm:$0xff]  ;;  %v729_v49 = vpack.c.bf16 %v325_v43, %v322_v42  ;;  %v335_v52 = vld [vmem:[#allocation8 + $0xf8] sm:$0xff] }
  0x51   :  { %684 = vmatprep.subr.bf16.mxu0 %v683_v57  ;;  %708 = vmatpush3.bf16.msra.mxu1 %v707_v58  ;;  %v731_v50 = vpack.c.bf16 %v332_v46, %v329_v44  ;;  %v328_v51 = vld [vmem:[#allocation8 + $0xc0] sm:$0xff]  ;;  %v757_v53 = vpack.c.bf16 %v327_v48, %v324_v47  ;;  %v338_v54 = vld [vmem:[#allocation8 + $0x110] sm:$0xff]  ;;  %v333_v56 = vld [vmem:[#allocation8 + $0xe8] sm:$0xff] }
  0x52   :  { %709 = vmatprep.subr.bf16.mxu1 %v890_v0  ;;  %v330_v55 = vld [vmem:[#allocation8 + $0xd0] sm:$0xff]  ;;  %v735_v58 = vpack.c.bf16 %v338_v54, %v335_v52  ;;  %v337_v60 = vld [vmem:[#allocation8 + $0x108] sm:$0xff]  ;;  %v344_v63 = vld [vmem:[#allocation8 + $0x140] sm:$0xff] }
  0x53   :  { %v334_v59 = vld [vmem:[#allocation8 + $0xf0] sm:$0xff]  ;;  %v341_v61 = vld [vmem:[#allocation8 + $0x128] sm:$0xff]  ;;  %v760_v62 = vpack.c.bf16 %v333_v56, %v330_v55  ;;  %v336_v2 = vld [vmem:[#allocation8 + $0x100] sm:$0xff] }
  0x54   :  { %686 = vmatpush1.bf16.msra.mxu0 %v685_v3  ;;  %v339_v3 = vld [vmem:[#allocation8 + $0x118] sm:$0xff]  ;;  %v340_v6 = vld [vmem:[#allocation8 + $0x120] sm:$0xff]  ;;  %v350_v10 = vld [vmem:[#allocation8 + $0x170] sm:$0xff] }
  0x55   :  { %688 = vmatprep.subr.bf16.mxu0 %v687_v4  ;;  %711 = vmatpush3.bf16.msra.mxu1 %v710_v5  ;;  %v737_v4 = vpack.c.bf16 %v337_v60, %v334_v59  ;;  %v739_v5 = vpack.c.bf16 %v344_v63, %v341_v61  ;;  %v343_v7 = vld [vmem:[#allocation8 + $0x138] sm:$0xff]  ;;  %v763_v9 = vpack.c.bf16 %v339_v3, %v336_v2  ;;  %v342_v11 = vld [vmem:[#allocation8 + $0x130] sm:$0xff]  ;;  %v349_v16 = vld [vmem:[#allocation8 + $0x168] sm:$0xff] }
  0x56   :  { %712 = vmatprep.subr.bf16.mxu1 %v890_v0  ;;  %v347_v8 = vld [vmem:[#allocation8 + $0x158] sm:$0xff]  ;;  %v346_v15 = vld [vmem:[#allocation8 + $0x150] sm:$0xff]  ;;  %v348_v18 = vld [vmem:[#allocation8 + $0x160] sm:$0xff] }
  0x57   :  { %v351_v19 = vld [vmem:[#allocation8 + $0x178] sm:$0xff]  ;;  %v745_v20 = vpack.c.bf16 %v349_v16, %v346_v15  ;;  %v352_v47 = vld [vmem:[%s1025_s5] sm:$0x7]  ;;  %s894_s5 = smov [#allocation9]  }
  0x58   :  { %690 = vmatpush1.bf16.msra.mxu0 %v689_v12  ;;  %v345_v12 = vld [vmem:[#allocation8 + $0x148] sm:$0xff]  ;;  %s543_s13 = sshll.u32 %s894_s5, 4  ;;  %s544_s13 = int_to_ptr.vmem [resolvable:$true] %s543_s13 }
  0x59   :  { %714 = vmatpush3.bf16.msra.mxu1 %v713_v13  ;;  %716 = vmatprep.subr.bf16.mxu0 %v715_v14  ;;  %v741_v13 = vpack.c.bf16 %v343_v7, %v340_v6  ;;  %v743_v14 = vpack.c.bf16 %v350_v10, %v347_v8  ;;  %v766_v17 = vpack.c.bf16 %v345_v12, %v342_v11  ;;  %s857_s14 = scalar_lea.vmem %s544_s13, 16  ;;  %s861_s15 = scalar_lea.vmem %s544_s13, 32 }
  0x5a   :  { %747 = vmatprep.subr.bf16.mxu1 %v890_v0  ;;  %p858_p10 = scmp.ne.s32.totalorder %s544_s13, %s857_s14  ;;  %p862_p11 = scmp.lt.s32.totalorder %s544_s13, %s544_s13 }
  0x5b   :  { %194 = vmatmul.mubr.f32.vlgmr.msra.gmra.mrb[0].mxu0 %v63_v21  ;;  %p863_p12 = scmp.lt.s32.totalorder %s861_s15, %s857_s14 }
  0x5c   :  { %718 = vmatpush1.bf16.msra.mxu0 %v717_v22  ;;  %622 = vmatmul.mubr.f32.vlgmr.msra.gmra.mrb[0].mxu1 %v63_v21  ;;  %v769_v21 = vpack.c.bf16 %v351_v19, %v348_v18  ;;  %v997_v22 = vld [vmem:[%s1021_s1] sm:$0x1] }
  0x5d   :  { %720 = vmatprep.subr.bf16.mxu0 %v719_v23  ;;  %749 = vmatpush3.bf16.msra.mxu1 %v748_v27  ;;  %v114_v23 = vlaneseq  ;;  %p864_p13 = por %p863_p12, %p862_p11 }
  0x5e   :  { %433 = vmatprep.mubr.f32.mxu0 %v891_v1  ;;  %750 = vmatprep.subr.bf16.mxu1 %v890_v0 }
  0x5f   :  { %656 = vmatprep.mubr.msk.f32.mxu1 %vm892_vm0, %v891_v1  ;;  %v331_v1 = vld [vmem:[#allocation8 + $0xd8] sm:$0xff]  ;;  %v115_v24 = vshrl.u32 %v114_v23, 7  ;;  %vm299_vm1 = vcmp.lt.s32.totalorder %v114_v23, 384  ;;  %p865_p0 = pnand %p864_p13, %p858_p10 }
  0x60   :  { %722 = vmatpush1.bf16.msra.mxu0 %v721_v31  ;;  %v733_v57 = vpack.c.bf16 %v331_v1, %v328_v51 }
  0x61   :  { %724 = vmatprep.subr.bf16.mxu0 %v723_v32  ;;  %752 = vmatpush3.bf16.msra.mxu1 %v751_v36  ;;  %v116_v27 = vsub.s32 0, %v115_v24  ;;  %v120_v28 = vsub.s32 1, %v115_v24  ;;  %v124_v29 = vsub.s32 2, %v115_v24  ;;  %v279_v35 = vsub.s32 %v276_v30, %v115_v24 }
  0x62   :  { %753 = vmatprep.subr.bf16.mxu1 %v890_v0 }
  0x63   :  { %v357_v48 = vrot.slane %v352_v47, %v116_v27  ;;  %v365_v63 = vrot.slane %v352_v47, %v124_v29 }
  0x64   :  { %726 = vmatpush1.bf16.msra.mxu0 %v725_v40 }
  0x65   :  { %728 = vmatprep.subr.bf16.mxu0 %v727_v41  ;;  %755 = vmatpush3.bf16.msra.mxu1 %v754_v45 }
  0x66   :  { %756 = vmatprep.subr.bf16.mxu1 %v890_v0 }
  0x68   :  { %730 = vmatpush1.bf16.msra.mxu0 %v729_v49  ;;  %v361_v49 = vrot.slane %v352_v47, %v120_v28 }
  0x69   :  { %732 = vmatprep.subr.bf16.mxu0 %v731_v50  ;;  %758 = vmatpush3.bf16.msra.mxu1 %v757_v53 }
  0x6a   :  { %759 = vmatprep.subr.bf16.mxu1 %v890_v0 }
  0x6c   :  { %734 = vmatpush1.bf16.msra.mxu0 %v733_v57 }
  0x6d   :  { %736 = vmatprep.subr.bf16.mxu0 %v735_v58  ;;  %761 = vmatpush3.bf16.msra.mxu1 %v760_v62 }
  0x6e   :  { %762 = vmatprep.subr.bf16.mxu1 %v890_v0 }
  0x70   :  { %738 = vmatpush1.bf16.msra.mxu0 %v737_v4 }
  0x71   :  { %740 = vmatprep.subr.bf16.mxu0 %v739_v5  ;;  %764 = vmatpush3.bf16.msra.mxu1 %v763_v9 }
  0x72   :  { %765 = vmatprep.subr.bf16.mxu1 %v890_v0 }
  0x74   :  { %742 = vmatpush1.bf16.msra.mxu0 %v741_v13 }
  0x75   :  { %744 = vmatprep.subr.bf16.mxu0 %v743_v14  ;;  %767 = vmatpush3.bf16.msra.mxu1 %v766_v17 }
  0x76   :  { %768 = vmatprep.subr.bf16.mxu1 %v890_v0  ;;  %v112_v0 = vld [vmem:[%s1024_s4] sm:$0x7] }
  0x77   :  { %v117_v31 = vrot.slane %v112_v0, %v116_v27  ;;  %v121_v32 = vrot.slane %v112_v0, %v120_v28  ;;  %v125_v33 = vrot.slane %v112_v0, %v124_v29 }
  0x78   :  { %746 = vmatpush1.bf16.msra.mxu0 %v745_v20 }
  0x79   :  { %770 = vmatpush3.bf16.msra.mxu1 %v769_v21 }
  0x7b   :  { %434 = vmatmul.mubr.f32.vlgmr.msra.gmra.mrb[2].mxu0 %v997_v22 }
  0x7c   :  { %657 = vmatmul.mubr.f32.vlgmr.msra.gmra.mrb[2].mxu1 %v997_v22 }
 0x12e   :  { %v195_v34 = vpop.f32.mrb[0].mxu0 }
 0x12f   :  { %v196_v36 = vadd.f32 %v195_v34, %v117_v31  ;;  %v197_v37 = vpop.f32.mrb[1].mxu0  ;;  %v266_v38 = vpop.f32.mrb[0].mxu1 }
 0x130   :  { %v198_v39 = vadd.f32 %v197_v37, %v121_v32  ;;  %v267_v40 = vadd.f32 %v266_v38, %v125_v33  ;;  %v623_v41 = vpop.f32.mrb[1].mxu1 }
 0x132   :  { %v273_v42 = vcombine.low %v196_v36, %v198_v39  ;;  %v287_v43 = vrot.slane %v267_v40, %v279_v35 }
 0x134   :  { %v280_v44 = vrot.slane %v273_v42, %v279_v35 }
 0x136   :  { %v288_v45 = vcombine.low %v280_v44, %v287_v43 }
 0x138   :  { %v295_v46 = vrot.slane %v288_v45, %v279_v35 }
 0x13a   :  { %301 = vst.msk [vmem:[#allocation2] sm:$0x7] %vm299_vm1, %v295_v46 }
 0x141   :  { %v303_v51 = vld [vmem:[#allocation2] sm:$0x7] }
 0x142   :  { %v518_v57 = vrot.slane %v303_v51, 1  ;;  %v528_v7 = vrot.slane %v303_v51, 2 }
 0x14e   :  { %v435_v50 = vpop.f32.mrb[2].mxu0 }
 0x14f   :  { %v436_v1 = vadd.f32 %v435_v50, %v357_v48  ;;  %v437_v52 = vpop.f32.mrb[3].mxu0  ;;  %v506_v53 = vpop.f32.mrb[2].mxu1 }
 0x150   :  { %v438_v54 = vadd.f32 %v437_v52, %v361_v49  ;;  %v658_v55 = vpop.f32.mrb[3].mxu1  ;;  %v507_v4 = vadd.f32 %v506_v53, %v365_v63 }
 0x151   :  { %v510_v56 = vadd.f32 %v436_v1, %v303_v51 }
 0x152   :  { %v520_v59 = vadd.f32 %v518_v57, %v438_v54 }
 0x153   :  { %v553_v58 = vmul.f32 -1.442695, %v510_v56 }
 0x154   :  { %v554_v60 = vmul.f32 -1.442695, %v520_v59 }
 0x155   :  { %781 = vpow2.f32 %v553_v58 }
 0x156   :  { %783 = vpow2.f32 %v554_v60 }
 0x15f   :  { %v782_v61 = vpop.eup %781 }
 0x160   :  { %v514_v62 = vadd.f32 1.0, %v782_v61  ;;  %v784_v2 = vpop.eup %783 }
 0x161   :  { %v524_v3 = vadd.f32 1.0, %v784_v2 }
 0x162   :  { %785 = vrcp.f32 %v514_v62 }
 0x163   :  { %787 = vrcp.f32 %v524_v3 }
 0x16c   :  { %v786_v5 = vpop.eup %785 }
 0x16d   :  { %v527_v6 = vmul.f32 %v786_v5, %v507_v4  ;;  %v788_v9 = vpop.eup %787 }
 0x16e   :  { %v532_v10 = vsub.f32 1.0, %v788_v9  ;;  %v534_v13 = vmul.f32 %v788_v9, %v997_v22 }
 0x16f   :  { %v530_v8 = vadd.f32 %v528_v7, %v527_v6 }
 0x171   :  { %789 = vtanh.f32 %v530_v8 }
 0x17b   :  { %v790_v11 = vpop.eup %789 }
 0x17c   :  { %v533_v12 = vmul.f32 %v790_v11, %v532_v10 }
 0x17e   :  { %v535_v14 = vadd.f32 %v534_v13, %v533_v12 }
 0x180   :  { %536 = vst [vmem:[#allocation9] sm:$0x1] %v535_v14 }
 0x181   :  { %868 = shalt.err (!%p865_p0)
}
 0x182   :  { %s869_s18 = scalar_lea.hbm %s1026_s6, 16 }
 0x183   :  { %p870_p1 = scmp.ne.s32.totalorder %s1026_s6, %s869_s18  ;;  %p873_p2 = scmp.lt.u32.totalorder %s869_s18, %s1026_s6 }
 0x185   :  { %p875_p3 = pnand %p873_p2, %p870_p1 }
 0x187   :  { %878 = shalt.err (!%p875_p3)
}
 0x188   :  { %546 = dma.vmem_to_hbm [thread:$0]  %s544_s13, 16, %s1026_s6, [#allocation5]  }
 0x189   :  { %883 = dma.done.wait [#allocation5], 16  }
 0x18a   :  { %884 = vsyncadd [#allocation5], 4294967280 }
 0x18b   :  { %550 = vsyncpa [#allocation4], 1 }
 0x18c   :  { %551 = vsyncpa [#allocation7], 1 }
 0x18d   :  { %552 = vsyncpa [#allocation5], 1 }

</bundles_post_ra>
